<compile_context>
chip_gen: v6e
topology: v6e:2x2x1
jax: 0.10.0
libtpu: 0.0.40
codegen_flags: <defaults>
</compile_context>

<pallas_src>
import functools

import jax
import jax.numpy as jnp
from jax.experimental import pallas as pl
from jax.experimental.pallas import tpu as pltpu


def _round_up(x, m):
    return ((x + m - 1) // m) * m


# ---------------------------------------------------------------------------
# Fused MLP kernel: one grid step processes one batch tile through ALL layers.
# Intermediate activations never leave VMEM/vregs.
# ---------------------------------------------------------------------------
def _fused_mlp_kernel(*refs, n_layers):
    # refs = (x_ref, w0_ref, b0_ref, w1_ref, b1_ref, ..., o_ref)
    x_ref = refs[0]
    o_ref = refs[-1]
    wb_refs = refs[1:-1]

    h = x_ref[...]
    for k in range(n_layers):
        w_ref = wb_refs[2 * k]          # [K_k, N_k]  (pre-transposed)
        b_ref = wb_refs[2 * k + 1]      # [1, N_k]
        h = jnp.dot(h, w_ref[...], preferred_element_type=jnp.float32)
        h = h + b_ref[...]              # broadcast over rows
        if k < n_layers - 1:
            # ReLU on hidden layers; Dropout is identity in eval mode.
            h = jnp.maximum(h, 0.0)
    o_ref[...] = h.astype(o_ref.dtype)


# ---------------------------------------------------------------------------
# Parameter init (PyTorch nn.Linear equivalent) and one-time prep.
# ---------------------------------------------------------------------------
def init_mlp_params(key, input_dim, h_sizes_list, output_dim):
    """PyTorch-Linear-style init: U(-1/sqrt(in), 1/sqrt(in)); W stored [out, in]."""
    dims = [input_dim] + list(h_sizes_list) + [output_dim]
    params = []
    for in_d, out_d in zip(dims[:-1], dims[1:]):
        key, kw, kb = jax.random.split(key, 3)
        bound = 1.0 / (in_d ** 0.5)
        w = jax.random.uniform(kw, (out_d, in_d), jnp.float32, -bound, bound)
        b = jax.random.uniform(kb, (out_d,), jnp.float32, -bound, bound)
        params.append((w, b))
    return params


def prepare_mlp_params(params):
    """One-time prep: transpose W to [in, out], reshape bias to [1, out].
    (No output-feature padding: the true-width store keeps the HBM write
    stream minimal; the per-row stripe is still contiguous.)"""
    return [(jnp.transpose(w), b.reshape(1, -1)) for (w, b) in params]


# ---------------------------------------------------------------------------
# Dense (non-Pallas) path, used for tiny batches where a kernel launch is
# pure overhead.  Same math as the kernel (prepared layout).
# ---------------------------------------------------------------------------
def _dense_from_prepared(x, prepared):
    n_layers = len(prepared)
    h = x
    for k, (w_t, b_r) in enumerate(prepared):
        h = h @ w_t + b_r
        if k < n_layers - 1:
            h = jnp.maximum(h, 0.0)
    return h


# ---------------------------------------------------------------------------
# Batch tiling: balanced tiles, >=2 tiles for v7x megacore when worthwhile.
# ---------------------------------------------------------------------------
def _choose_tiling(M, max_block_m, megacore_split_rows=256):
    n_tiles = pl.cdiv(M, max_block_m)
    if M >= megacore_split_rows:
        # v7x has 2 TensorCores; make sure "parallel" has >=2 steps to shard.
        n_tiles = max(n_tiles, 2)
    block_m = _round_up(pl.cdiv(M, n_tiles), 8)
    m_pad = _round_up(M, block_m)      # pads < 8 rows per tile
    return block_m, m_pad


# ---------------------------------------------------------------------------
# Forward pass: single fused pallas_call, batch-tiled.
# ---------------------------------------------------------------------------
def mlp_custom_forward(x, prepared, *, max_block_m=1024,
                       small_batch_threshold=512, force_pallas=False,
                       single_buffer_weights=False):
    n_layers = len(prepared)
    M, K = x.shape
    assert K == prepared[0][0].shape[0]
    n_out = prepared[-1][0].shape[1]

    # Small-batch fast path: a Pallas launch is 100% overhead for tiny M;
    # XLA fuses this chain into one fusion anyway.
    if M < small_batch_threshold and not force_pallas:
        return _dense_from_prepared(x, prepared)

    block_m, m_pad = _choose_tiling(M, max_block_m)
    if m_pad != M:
        x = jnp.pad(x, ((0, m_pad - M), (0, 0)))
    grid = (m_pad // block_m,)

    in_specs = [pl.BlockSpec((block_m, K), lambda i: (i, 0))]
    flat_args = [x]
    # Weights/biases: constant index_maps keep them VMEM-resident across the
    # grid.  For v7x with large hidden sizes, single_buffer_weights=True
    # removes the default double-buffering of these resident blocks.
    wb_kwargs = (
        dict(pipeline_mode=pl.Buffered(1)) if single_buffer_weights else {}
    )
    for w_t, b_r in prepared:
        k_l, n_l = w_t.shape
        in_specs.append(pl.BlockSpec((k_l, n_l), lambda i: (0, 0), **wb_kwargs))
        in_specs.append(pl.BlockSpec((1, n_l), lambda i: (0, 0), **wb_kwargs))
        flat_args.append(w_t)
        flat_args.append(b_r)

    # Explicit scoped-VMEM limit: raise above v5e's 16 MiB default when tiles/
    # weights grow, but stay <= 32 MiB (safe on v7x's 64 MiB physical VMEM).
    w_bytes = sum(w.size * 4 + b.size * 4 for w, b in prepared)
    widest = max(w.shape[1] for w, _ in prepared)
    est = (2 * block_m * (K + n_out) * 4                 # in/out, double-buffered
           + (1 if single_buffer_weights else 2) * w_bytes
           + block_m * widest * 4)                       # widest intermediate
    vmem_limit = int(min(32 << 20, max(16 << 20, 2 * est)))

    out = pl.pallas_call(
        functools.partial(_fused_mlp_kernel, n_layers=n_layers),
        out_shape=jax.ShapeDtypeStruct((m_pad, n_out), x.dtype),
        grid=grid,
        in_specs=in_specs,
        out_specs=pl.BlockSpec((block_m, n_out), lambda i: (i, 0)),
        compiler_params=pltpu.CompilerParams(
            dimension_semantics=("parallel",),
            vmem_limit_bytes=vmem_limit),
    )(*flat_args)

    if m_pad != M:
        out = out[:M]
    return out


# ---------------------------------------------------------------------------
# Pure-JAX reference (PyTorch layout: y = x @ W.T + b).
# ---------------------------------------------------------------------------
def mlp_custom_reference(x, params):
    n_layers = len(params)
    for k, (w, b) in enumerate(params):
        x = x @ w.T + b
        if k < n_layers - 1:
            x = jnp.maximum(x, 0.0)
    return x


if __name__ == "__main__":
    # Module config (mode='normal'): input_dim=16, h_sizes=[32, 32],
    # d_prob=[0.1, 0.1], output_dim=8, non_linearity=ReLU, dropout=True.
    input_dim = 16
    h_sizes_list = [32, 32]
    output_dim = 8

    key = jax.random.PRNGKey(0)
    kx_small, kx_big, kp = jax.random.split(key, 3)
    params = init_mlp_params(kp, input_dim, h_sizes_list, output_dim)
    prepared = prepare_mlp_params(params)

    fwd = jax.jit(functools.partial(mlp_custom_forward, force_pallas=True))

    # (1) Small batch: single-tile Pallas path (force_pallas so the kernel is
    #     actually exercised instead of the small-batch fast path).
    x_small = jax.random.normal(kx_small, (8, input_dim), dtype=jnp.float32)
    out_small = jax.block_until_ready(fwd(x_small, prepared))
    ref_small = mlp_custom_reference(x_small, params)
    assert out_small.shape == (8, output_dim), out_small.shape
    assert jnp.allclose(out_small, ref_small, atol=1e-5, rtol=1e-5), \
        "small-batch mismatch vs reference"

    # (2) Larger ragged batch: exercises balanced tiling, >=2 parallel tiles
    #     (megacore / v7x sharding) and batch-pad slice-off.
    x_big = jax.random.normal(kx_big, (600, input_dim), dtype=jnp.float32)
    out_big = jax.block_until_ready(fwd(x_big, prepared))
    ref_big = mlp_custom_reference(x_big, params)
    assert out_big.shape == (600, output_dim), out_big.shape
    assert jnp.allclose(out_big, ref_big, atol=1e-4, rtol=1e-4), \
        "large-batch mismatch vs reference"

    print("KERNEL_OK")
</pallas_src>

<mosaic_0001>
module attributes {stable_mosaic.version = 11 : i64} {
  func.func @_fused_mlp_kernel(%arg0: i32, %arg1: memref<8x16xf32, #tpu.memory_space<vmem>>, %arg2: memref<16x32xf32, #tpu.memory_space<vmem>>, %arg3: memref<1x32xf32, #tpu.memory_space<vmem>>, %arg4: memref<32x32xf32, #tpu.memory_space<vmem>>, %arg5: memref<1x32xf32, #tpu.memory_space<vmem>>, %arg6: memref<32x8xf32, #tpu.memory_space<vmem>>, %arg7: memref<1x8xf32, #tpu.memory_space<vmem>>, %arg8: memref<8x8xf32, #tpu.memory_space<vmem>>) attributes {dimension_semantics = [#tpu.dimension_semantics<parallel>], iteration_bounds = array<i64: 1>, scalar_prefetch = 0 : i64, scratch_operands = 0 : i64, tpu.core_type = #tpu.core_type<tc>, window_params = [{transform_indices = @transform_0, window_bounds = array<i64: 8, 16>}, {pipeline_mode = #tpu.pipeline_mode<synchronous>, transform_indices = @transform_1, window_bounds = array<i64: 16, 32>}, {pipeline_mode = #tpu.pipeline_mode<synchronous>, transform_indices = @transform_2, window_bounds = array<i64: 1, 32>}, {pipeline_mode = #tpu.pipeline_mode<synchronous>, transform_indices = @transform_3, window_bounds = array<i64: 32, 32>}, {pipeline_mode = #tpu.pipeline_mode<synchronous>, transform_indices = @transform_4, window_bounds = array<i64: 1, 32>}, {pipeline_mode = #tpu.pipeline_mode<synchronous>, transform_indices = @transform_5, window_bounds = array<i64: 32, 8>}, {pipeline_mode = #tpu.pipeline_mode<synchronous>, transform_indices = @transform_6, window_bounds = array<i64: 1, 8>}, {transform_indices = @transform_7, window_bounds = array<i64: 8, 8>}]} {
    %c0 = arith.constant 0 : index
    %c0_0 = arith.constant 0 : index
    %0 = vector.load %arg1[%c0, %c0_0] : memref<8x16xf32, #tpu.memory_space<vmem>>, vector<8x16xf32>
    %c0_1 = arith.constant 0 : index
    %c0_2 = arith.constant 0 : index
    %1 = vector.load %arg2[%c0_1, %c0_2] : memref<16x32xf32, #tpu.memory_space<vmem>>, vector<16x32xf32>
    %cst = arith.constant dense<0.000000e+00> : vector<8x32xf32>
    %2 = tpu.matmul %0, %1, %cst {dimension_numbers = #tpu.dot_dimension_numbers<[1], [0], [0], [1], [0, 0, 1, 1], [], []>} : vector<8x16xf32>, vector<16x32xf32>, vector<8x32xf32> -> vector<8x32xf32>
    %c0_3 = arith.constant 0 : index
    %c0_4 = arith.constant 0 : index
    %3 = vector.load %arg3[%c0_3, %c0_4] : memref<1x32xf32, #tpu.memory_space<vmem>>, vector<1x32xf32>
    %4 = vector.broadcast %3 : vector<1x32xf32> to vector<8x32xf32>
    %5 = arith.addf %2, %4 : vector<8x32xf32>
    %cst_5 = arith.constant 0.000000e+00 : f32
    %6 = vector.broadcast %cst_5 : f32 to vector<8x32xf32>
    %7 = arith.maximumf %5, %6 : vector<8x32xf32>
    %c0_6 = arith.constant 0 : index
    %c0_7 = arith.constant 0 : index
    %8 = vector.load %arg4[%c0_6, %c0_7] : memref<32x32xf32, #tpu.memory_space<vmem>>, vector<32x32xf32>
    %cst_8 = arith.constant dense<0.000000e+00> : vector<8x32xf32>
    %9 = tpu.matmul %7, %8, %cst_8 {dimension_numbers = #tpu.dot_dimension_numbers<[1], [0], [0], [1], [0, 0, 1, 1], [], []>} : vector<8x32xf32>, vector<32x32xf32>, vector<8x32xf32> -> vector<8x32xf32>
    %c0_9 = arith.constant 0 : index
    %c0_10 = arith.constant 0 : index
    %10 = vector.load %arg5[%c0_9, %c0_10] : memref<1x32xf32, #tpu.memory_space<vmem>>, vector<1x32xf32>
    %11 = vector.broadcast %10 : vector<1x32xf32> to vector<8x32xf32>
    %12 = arith.addf %9, %11 : vector<8x32xf32>
    %cst_11 = arith.constant 0.000000e+00 : f32
    %13 = vector.broadcast %cst_11 : f32 to vector<8x32xf32>
    %14 = arith.maximumf %12, %13 : vector<8x32xf32>
    %c0_12 = arith.constant 0 : index
    %c0_13 = arith.constant 0 : index
    %15 = vector.load %arg6[%c0_12, %c0_13] : memref<32x8xf32, #tpu.memory_space<vmem>>, vector<32x8xf32>
    %cst_14 = arith.constant dense<0.000000e+00> : vector<8x8xf32>
    %16 = tpu.matmul %14, %15, %cst_14 {dimension_numbers = #tpu.dot_dimension_numbers<[1], [0], [0], [1], [0, 0, 1, 1], [], []>} : vector<8x32xf32>, vector<32x8xf32>, vector<8x8xf32> -> vector<8x8xf32>
    %c0_15 = arith.constant 0 : index
    %c0_16 = arith.constant 0 : index
    %17 = vector.load %arg7[%c0_15, %c0_16] : memref<1x8xf32, #tpu.memory_space<vmem>>, vector<1x8xf32>
    %18 = vector.broadcast %17 : vector<1x8xf32> to vector<8x8xf32>
    %19 = arith.addf %16, %18 : vector<8x8xf32>
    %c0_17 = arith.constant 0 : index
    %c0_18 = arith.constant 0 : index
    %20 = vector.load %arg8[%c0_17, %c0_18] : memref<8x8xf32, #tpu.memory_space<vmem>>, vector<8x8xf32>
    tpu.vector_store %arg8[%c0_17, %c0_18], %19 {strides = array<i32>} : memref<8x8xf32, #tpu.memory_space<vmem>>, vector<8x8xf32>,
    return
  }
  func.func @transform_0(%arg0: i32) -> (i32, i32) {
    %c0_i32 = arith.constant 0 : i32
    %c0_i32_0 = arith.constant 0 : i32
    return %arg0, %c0_i32 : i32, i32
  }
  func.func @transform_1(%arg0: i32) -> (i32, i32) {
    %c0_i32 = arith.constant 0 : i32
    %c0_i32_0 = arith.constant 0 : i32
    %c0_i32_1 = arith.constant 0 : i32
    return %c0_i32, %c0_i32_0 : i32, i32
  }
  func.func @transform_2(%arg0: i32) -> (i32, i32) {
    %c0_i32 = arith.constant 0 : i32
    %c0_i32_0 = arith.constant 0 : i32
    %c0_i32_1 = arith.constant 0 : i32
    return %c0_i32, %c0_i32_0 : i32, i32
  }
  func.func @transform_3(%arg0: i32) -> (i32, i32) {
    %c0_i32 = arith.constant 0 : i32
    %c0_i32_0 = arith.constant 0 : i32
    %c0_i32_1 = arith.constant 0 : i32
    return %c0_i32, %c0_i32_0 : i32, i32
  }
  func.func @transform_4(%arg0: i32) -> (i32, i32) {
    %c0_i32 = arith.constant 0 : i32
    %c0_i32_0 = arith.constant 0 : i32
    %c0_i32_1 = arith.constant 0 : i32
    return %c0_i32, %c0_i32_0 : i32, i32
  }
  func.func @transform_5(%arg0: i32) -> (i32, i32) {
    %c0_i32 = arith.constant 0 : i32
    %c0_i32_0 = arith.constant 0 : i32
    %c0_i32_1 = arith.constant 0 : i32
    return %c0_i32, %c0_i32_0 : i32, i32
  }
  func.func @transform_6(%arg0: i32) -> (i32, i32) {
    %c0_i32 = arith.constant 0 : i32
    %c0_i32_0 = arith.constant 0 : i32
    %c0_i32_1 = arith.constant 0 : i32
    return %c0_i32, %c0_i32_0 : i32, i32
  }
  func.func @transform_7(%arg0: i32) -> (i32, i32) {
    %c0_i32 = arith.constant 0 : i32
    %c0_i32_0 = arith.constant 0 : i32
    return %arg0, %c0_i32 : i32, i32
  }
}

</mosaic_0001>

<bundles_post_ra>
// kernel: mlp_custom_forward.1
= control target key start
LH: loop header
LB: loop body
LE: loop exit
PB: predicated region body
PF: predicated region fallthrough
CT: control target
= control target key end

     0   :  { %12 = vsyncpa [#allocation3], 0  ;;  %s541_s0 = inlined_call_operand.vmem [shape: f32[8,16], index: 0, kind: input, shape index: {}]   ;;  %s542_s1 = inlined_call_operand.hbm [shape: f32[16,32], index: 1, kind: input, shape index: {}]   ;;  %s543_s2 = inlined_call_operand.vmem [shape: f32[1,32], index: 2, kind: input, shape index: {}]   ;;  %s544_s3 = inlined_call_operand.vmem [shape: f32[32,32], index: 3, kind: input, shape index: {}]   ;;  %s545_s4 = inlined_call_operand.hbm [shape: f32[1,32], index: 4, kind: input, shape index: {}]   ;;  %s546_s5 = inlined_call_operand.vmem [shape: f32[32,8], index: 5, kind: input, shape index: {}]   ;;  %s547_s6 = inlined_call_operand.vmem [shape: f32[1,8], index: 6, kind: input, shape index: {}]   ;;  %s548_s7 = inlined_call_operand.hbm [shape: f32[8,8], index: 7, kind: output, shape index: {}]  }
   0x1   :  { %13 = vsyncpa [#allocation6], 0 }
   0x2   :  { %14 = vsyncpa [#allocation4], 0  ;;  %s447_s24 = smov [#allocation2]  }
   0x3   :  { %s22_s25 = sshll.u32 %s447_s24, 4  ;;  %s23_s25 = int_to_ptr.vmem [resolvable:$true] %s22_s25 }
   0x4   :  { %s389_s26 = scalar_lea.vmem %s23_s25, 256  ;;  %p394_p1 = scmp.lt.s32.totalorder %s23_s25, %s23_s25 }
   0x5   :  { %p390_p0 = scmp.ne.s32.totalorder %s23_s25, %s389_s26  ;;  %p395_p2 = scmp.lt.s32.totalorder %s389_s26, %s389_s26 }
   0x7   :  { %p396_p3 = por %p395_p2, %p394_p1 }
   0x9   :  { %p397_p4 = pnand %p396_p3, %p390_p0 }
   0xb   :  { %400 = shalt.err (!%p397_p4)
}
   0xc   :  { %s448_s27 = smov 128   ;;  %s449_s28 = smov 8  }
   0xd   :  { %28 = dma.hbm_to_vmem [thread:$0]  %s542_s1, 256, %s23_s25, [#allocation3], %s448_s27, %s448_s27, %s449_s28  }
   0xe   :  { %s450_s8 = smov [#allocation5]  }
   0xf   :  { %s39_s9 = sshll.u32 %s450_s8, 4  ;;  %s40_s9 = int_to_ptr.vmem [resolvable:$true] %s39_s9 }
  0x10   :  { %s409_s10 = scalar_lea.vmem %s40_s9, 16  ;;  %s413_s11 = scalar_lea.vmem %s40_s9, 32 }
  0x11   :  { %p410_p5 = scmp.ne.s32.totalorder %s40_s9, %s409_s10  ;;  %p414_p6 = scmp.lt.s32.totalorder %s40_s9, %s40_s9 }
  0x12   :  { %p415_p7 = scmp.lt.s32.totalorder %s413_s11, %s409_s10 }
  0x14   :  { %p416_p8 = por %p415_p7, %p414_p6 }
  0x16   :  { %p417_p9 = pnand %p416_p8, %p410_p5 }
  0x18   :  { %420 = shalt.err (!%p417_p9)
}
  0x19   :  { %42 = dma.hbm_to_vmem [thread:$0]  %s545_s4, 16, %s40_s9, [#allocation6]  }
  0x1a   :  { %441 = dma.done.wait [#allocation3], 256  }
  0x1b   :  { %442 = vsyncadd [#allocation3], 4294967040 }
  0x1c   :  { %443 = dma.done.wait [#allocation6], 16  }
  0x1d   :  { %444 = vsyncadd [#allocation6], 4294967280  ;;  %v451_v0 = vmov 0.0   ;;  %vm452_vm0 = vmmov 0   ;;  %v55_v1 = vld [vmem:[#allocation2 + $0x8] sm:$0xff]  ;;  %v54_v2 = vld [vmem:[#allocation2] sm:$0xff] }
  0x1e   :  { %345 = vmatprep.subr.mxu0 %v451_v0  ;;  %349 = vmatprep.mubr.msk.f32.mxu0 %vm452_vm0, %v451_v0  ;;  %v53_v3 = vld [vmem:[%s541_s0] sm:$0xff]  ;;  %vm63_vm1 = vcmask 130048   ;;  %v141_v4 = vld [vmem:[%s544_s3 + $0x18] sm:$0xff]  ;;  %v140_v5 = vld [vmem:[%s544_s3 + $0x10] sm:$0xff]  ;;  %vm149_vm2 = vcmask 261120   ;;  %s453_s8 = smov [#allocation7]  }
  0x1f   :  { %352 = vmatprep.subr.mxu1 %v451_v0  ;;  %360 = vmatprep.mubr.msk.f32.mxu1 %vm452_vm0, %v451_v0  ;;  %v139_v6 = vld [vmem:[%s544_s3 + $0x8] sm:$0xff]  ;;  %v138_v7 = vld [vmem:[%s544_s3] sm:$0xff]  ;;  %v227_v8 = vld [vmem:[%s546_s5 + $0x18] sm:$0xff]  ;;  %s316_s9 = sshll.u32 %s453_s8, 4  ;;  %vm308_vm3 = vcmask 64512   ;;  %s317_s9 = int_to_ptr.vmem [resolvable:$true] %s316_s9 }
  0x20   :  { %346 = vmatpush3.msra.mxu0 %v55_v1  ;;  %353 = vmatpush3.msra.mxu1 %v141_v4  ;;  %v326_v9 = vld [vmem:[%s543_s2] ss:$0 sm:$0xff]  ;;  %v226_v14 = vld [vmem:[%s546_s5 + $0x10] sm:$0xff]  ;;  %v225_v15 = vld [vmem:[%s546_s5 + $0x8] sm:$0xff]  ;;  %p426_p11 = scmp.lt.s32.totalorder %s317_s9, %s317_s9 }
  0x21   :  { %347 = vmatprep.subr.mxu0 %v451_v0  ;;  %354 = vmatprep.subr.mxu1 %v451_v0  ;;  %v224_v16 = vld [vmem:[%s546_s5] sm:$0xff]  ;;  %v328_v17 = vld [vmem:[#allocation5] ss:$0 sm:$0xff]  ;;  %s421_s5 = scalar_lea.vmem %s317_s9, 128 }
  0x22   :  { %348 = vmatpush3.msra.mxu0 %v54_v2  ;;  %355 = vmatpush3.msra.mxu1 %v140_v5  ;;  %v330_v22 = vld [vmem:[%s547_s6] ss:$0 sm:$0xff]  ;;  %p422_p10 = scmp.ne.s32.totalorder %s317_s9, %s421_s5  ;;  %p427_p12 = scmp.lt.s32.totalorder %s421_s5, %s421_s5 }
  0x23   :  { %350 = vmatmul.mubr.msk.f32.vlgmr.msra.gmra.mxu0 %vm63_vm1, %v53_v3  ;;  %363 = vmatprep.subr.mxu0 %v451_v0 }
  0x24   :  { %371 = vmatprep.mubr.msk.f32.mxu0 %vm452_vm0, %v451_v0  ;;  %356 = vmatprep.subr.mxu1 %v451_v0  ;;  %p428_p13 = por %p427_p12, %p426_p11 }
  0x25   :  { %357 = vmatpush3.msra.mxu1 %v139_v6  ;;  %364 = vmatpush3.msra.mxu0 %v227_v8 }
  0x26   :  { %358 = vmatprep.subr.mxu1 %v451_v0  ;;  %365 = vmatprep.subr.mxu0 %v451_v0  ;;  %p429_p0 = pnand %p428_p13, %p422_p10 }
  0x27   :  { %359 = vmatpush3.msra.mxu1 %v138_v7  ;;  %366 = vmatpush3.msra.mxu0 %v226_v14 }
  0x28   :  { %367 = vmatprep.subr.mxu0 %v451_v0 }
  0x29   :  { %368 = vmatpush3.msra.mxu0 %v225_v15 }
  0x2a   :  { %369 = vmatprep.subr.mxu0 %v451_v0 }
  0x2b   :  { %370 = vmatpush3.msra.mxu0 %v224_v16 }
  0xe3   :  { %v133_v10 = vpop.f32.mrf.mxu0 }
  0xe4   :  { %v134_v11 = vadd.f32 %v326_v9, %v133_v10 }
  0xe5   :  { %v351_v12 = vpop.f32.mrf.mxu0 }
  0xe6   :  { %v137_v13 = vmax.f32 %v134_v11, 0.0 }
  0xe8   :  { %361 = vmatmul.mubr.msk.f32.vlgmr.msra.gmra.mxu1 %vm149_vm2, %v137_v13 }
 0x1a8   :  { %v219_v18 = vpop.f32.mrf.mxu1 }
 0x1a9   :  { %v220_v19 = vadd.f32 %v328_v17, %v219_v18 }
 0x1aa   :  { %v362_v20 = vpop.f32.mrf.mxu1 }
 0x1ab   :  { %v223_v21 = vmax.f32 %v220_v19, 0.0 }
 0x1ad   :  { %372 = vmatmul.mubr.msk.f32.vlgmr.msra.gmra.mxu0 %vm149_vm2, %v223_v21 }
 0x26d   :  { %v304_v23 = vpop.f32.mrf.mxu0 }
 0x26e   :  { %v305_v24 = vadd.f32 %v330_v22, %v304_v23 }
 0x26f   :  { %v373_v25 = vpop.f32.mrf.mxu0 }
 0x270   :  { %309 = vst.msk [vmem:[#allocation7] sm:$0xff] %vm308_vm3, %v305_v24 }
 0x271   :  { %432 = shalt.err (!%p429_p0)
}
 0x272   :  { %319 = dma.vmem_to_hbm [thread:$0]  %s317_s9, 128, %s548_s7, [#allocation4]  }
 0x273   :  { %445 = dma.done.wait [#allocation4], 128  }
 0x274   :  { %446 = vsyncadd [#allocation4], 4294967168 }
 0x275   :  { %323 = vsyncpa [#allocation3], 1 }
 0x276   :  { %324 = vsyncpa [#allocation6], 1 }
 0x277   :  { %325 = vsyncpa [#allocation4], 1 }

</bundles_post_ra>
